<compile_context>
chip_gen: v7x
topology: tpu7x:2x2x1
jax: 0.10.0
libtpu: 0.0.40
codegen_flags: <defaults>
</compile_context>

<pallas_src>
import functools

import jax
import jax.numpy as jnp
from jax.experimental import pallas as pl
from jax.experimental.pallas import tpu as pltpu

_HIDDEN1 = 128   # lay1 output width
_HIDDEN2 = 16    # lay2 logical output width
_HIDDEN2_PAD = 128  # lay2 padded width (lane-dense)


def _round_up(n, m):
    return ((n + m - 1) // m) * m


def _default_grid_steps():
    """>=2 grid steps on dual-TensorCore chips (v7x), single step otherwise."""
    try:
        kind = jax.devices()[0].device_kind.lower()
    except Exception:
        return 1
    return 2 if ("v7" in kind or "7x" in kind) else 1


def _mlp_kernel(x_ref, w1_ref, b1_ref, w2_ref, b2_ref, w3_ref, b3_ref, o_ref):
    # Fused 3-layer MLP per batch tile. bf16 MXU operands, f32 accumulate.
    x = x_ref[...].astype(jnp.bfloat16)                                 # (tb, i)
    h1 = jnp.dot(x, w1_ref[...], preferred_element_type=jnp.float32) + b1_ref[...]
    h1 = jnp.maximum(h1, 0.0).astype(jnp.bfloat16)                      # (tb, 128)
    h2 = jnp.dot(h1, w2_ref[...], preferred_element_type=jnp.float32) + b2_ref[...]
    h2 = jnp.maximum(h2, 0.0).astype(jnp.bfloat16)                      # (tb, 128) padded hidden
    y = jnp.dot(h2, w3_ref[...], preferred_element_type=jnp.float32) + b3_ref[...]
    o_ref[...] = y.astype(o_ref.dtype)                                  # (tb, o) unpadded


def prepare_params(w1, b1, w2, b2, w3, b3):
    """One-time cast/pad of the weights (call once, reuse across forward calls).

    w1: (i,128)  b1: (1,128)
    w2: (128,16) b2: (1,16)
    w3: (16,o)   b3: (1,o)
    Returns bf16 weights with the 16-wide hidden zero-padded to 128 (exact).
    """
    w1_bf = w1.astype(jnp.bfloat16)
    w2_bf = jnp.pad(w2, ((0, 0), (0, _HIDDEN2_PAD - w2.shape[1]))).astype(jnp.bfloat16)
    b2_p = jnp.pad(b2, ((0, 0), (0, _HIDDEN2_PAD - b2.shape[1])))
    w3_bf = jnp.pad(w3, ((0, _HIDDEN2_PAD - w3.shape[0]), (0, 0))).astype(jnp.bfloat16)
    return w1_bf, b1, w2_bf, b2_p, w3_bf, b3


@functools.partial(jax.jit, static_argnames=("grid_steps",))
def solve_forward(x, w1_bf, b1, w2_bf, b2_p, w3_bf, b3, *, grid_steps=1):
    """x: (B, i) float32. Prepared params from prepare_params(). Returns (B, o) f32."""
    B, i = x.shape
    o = w3_bf.shape[1]

    steps = max(int(grid_steps), 1)
    # Batch tile: multiple of 16 (bf16 sublane packing), derived from B so we
    # never compute more padded rows than one tile's worth of rounding.
    block_eff = _round_up(pl.cdiv(B, steps), 16)
    Bp = _round_up(B, block_eff)
    xp = x if Bp == B else jnp.pad(x, ((0, Bp - B), (0, 0)))

    grid = (Bp // block_eff,)
    y = pl.pallas_call(
        _mlp_kernel,
        out_shape=jax.ShapeDtypeStruct((Bp, o), jnp.float32),
        grid_spec=pl.GridSpec(
            grid=grid,
            in_specs=[
                pl.BlockSpec((block_eff, i), lambda n: (n, 0)),          # x tile (f32, cast in-kernel)
                pl.BlockSpec((i, _HIDDEN1), lambda n: (0, 0)),           # W1 (grid-invariant)
                pl.BlockSpec((1, _HIDDEN1), lambda n: (0, 0)),           # b1
                pl.BlockSpec((_HIDDEN1, _HIDDEN2_PAD), lambda n: (0, 0)),  # W2 (cols padded to 128)
                pl.BlockSpec((1, _HIDDEN2_PAD), lambda n: (0, 0)),       # b2 (padded)
                pl.BlockSpec((_HIDDEN2_PAD, o), lambda n: (0, 0)),       # W3 (rows padded to 128)
                pl.BlockSpec((1, o), lambda n: (0, 0)),                  # b3
            ],
            out_specs=pl.BlockSpec((block_eff, o), lambda n: (n, 0)),    # unpadded output
        ),
        compiler_params=pltpu.CompilerParams(
            dimension_semantics=("parallel",),
        ),
    )(xp, w1_bf, b1, w2_bf, b2_p, w3_bf, b3)

    return y if Bp == B else y[:B]


def init_params(key, i, o):
    """Deterministic init matching PyTorch Linear's U(-1/sqrt(fan_in), 1/sqrt(fan_in))."""
    ks = jax.random.split(key, 6)

    def lin(kw, kb, fan_in, fan_out):
        bound = 1.0 / jnp.sqrt(fan_in)
        w = jax.random.uniform(kw, (fan_in, fan_out), jnp.float32, -bound, bound)
        b = jax.random.uniform(kb, (1, fan_out), jnp.float32, -bound, bound)
        return w, b

    w1, b1 = lin(ks[0], ks[1], i, _HIDDEN1)
    w2, b2 = lin(ks[2], ks[3], _HIDDEN1, _HIDDEN2)
    w3, b3 = lin(ks[4], ks[5], _HIDDEN2, o)
    return w1, b1, w2, b2, w3, b3


if __name__ == "__main__":
    key = jax.random.PRNGKey(0)
    k_x, k_p = jax.random.split(key)

    B, i, o = 256, 32, 4  # Solve(i=32, o=4)
    x = jax.random.normal(k_x, (B, i), jnp.float32)
    w1, b1, w2, b2, w3, b3 = init_params(k_p, i, o)

    # One-time weight prep (bf16 cast + hidden padding), reused across calls.
    params = prepare_params(w1, b1, w2, b2, w3, b3)
    params = jax.tree_util.tree_map(jax.block_until_ready, params)

    steps = _default_grid_steps()
    y = solve_forward(x, *params, grid_steps=steps)
    y = jax.block_until_ready(y)

    # Reference: same bf16-operand / f32-accumulate math in plain JAX.
    xb = x.astype(jnp.bfloat16).astype(jnp.float32)
    w1b = w1.astype(jnp.bfloat16).astype(jnp.float32)
    w2b = w2.astype(jnp.bfloat16).astype(jnp.float32)
    w3b = w3.astype(jnp.bfloat16).astype(jnp.float32)
    h1 = jnp.maximum(xb @ w1b + b1, 0.0)
    h2 = jnp.maximum(h1.astype(jnp.bfloat16).astype(jnp.float32) @ w2b + b2, 0.0)
    y_ref = h2.astype(jnp.bfloat16).astype(jnp.float32) @ w3b + b3

    assert y.shape == (B, o)
    assert jnp.allclose(y, y_ref, atol=2e-2, rtol=2e-2), "mismatch vs reference"

    print("KERNEL_OK")
</pallas_src>

<mosaic_0001>
module attributes {stable_mosaic.version = 11 : i64} {
  func.func @_mlp_kernel(%arg0: i32, %arg1: memref<256x32xf32, #tpu.memory_space<vmem>>, %arg2: memref<32x128xbf16, #tpu.memory_space<vmem>>, %arg3: memref<1x128xf32, #tpu.memory_space<vmem>>, %arg4: memref<128x128xbf16, #tpu.memory_space<vmem>>, %arg5: memref<1x128xf32, #tpu.memory_space<vmem>>, %arg6: memref<128x4xbf16, #tpu.memory_space<vmem>>, %arg7: memref<1x4xf32, #tpu.memory_space<vmem>>, %arg8: memref<256x4xf32, #tpu.memory_space<vmem>>) attributes {dimension_semantics = [#tpu.dimension_semantics<parallel>], iteration_bounds = array<i64: 1>, scalar_prefetch = 0 : i64, scratch_operands = 0 : i64, tpu.core_type = #tpu.core_type<tc>, window_params = [{transform_indices = @transform_0, window_bounds = array<i64: 256, 32>}, {pipeline_mode = #tpu.pipeline_mode<synchronous>, transform_indices = @transform_1, window_bounds = array<i64: 32, 128>}, {pipeline_mode = #tpu.pipeline_mode<synchronous>, transform_indices = @transform_2, window_bounds = array<i64: 1, 128>}, {pipeline_mode = #tpu.pipeline_mode<synchronous>, transform_indices = @transform_3, window_bounds = array<i64: 128, 128>}, {pipeline_mode = #tpu.pipeline_mode<synchronous>, transform_indices = @transform_4, window_bounds = array<i64: 1, 128>}, {pipeline_mode = #tpu.pipeline_mode<synchronous>, transform_indices = @transform_5, window_bounds = array<i64: 128, 4>}, {pipeline_mode = #tpu.pipeline_mode<synchronous>, transform_indices = @transform_6, window_bounds = array<i64: 1, 4>}, {transform_indices = @transform_7, window_bounds = array<i64: 256, 4>}]} {
    %c0 = arith.constant 0 : index
    %c0_0 = arith.constant 0 : index
    %0 = vector.load %arg1[%c0, %c0_0] : memref<256x32xf32, #tpu.memory_space<vmem>>, vector<256x32xf32>
    %1 = arith.truncf %0 : vector<256x32xf32> to vector<256x32xbf16>
    %c0_1 = arith.constant 0 : index
    %c0_2 = arith.constant 0 : index
    %2 = vector.load %arg2[%c0_1, %c0_2] : memref<32x128xbf16, #tpu.memory_space<vmem>>, vector<32x128xbf16>
    %cst = arith.constant dense<0.000000e+00> : vector<256x128xf32>
    %3 = tpu.matmul %1, %2, %cst {dimension_numbers = #tpu.dot_dimension_numbers<[1], [0], [0], [1], [0, 0, 1, 1], [], []>} : vector<256x32xbf16>, vector<32x128xbf16>, vector<256x128xf32> -> vector<256x128xf32>
    %c0_3 = arith.constant 0 : index
    %c0_4 = arith.constant 0 : index
    %4 = vector.load %arg3[%c0_3, %c0_4] : memref<1x128xf32, #tpu.memory_space<vmem>>, vector<1x128xf32>
    %5 = vector.broadcast %4 : vector<1x128xf32> to vector<256x128xf32>
    %6 = arith.addf %3, %5 : vector<256x128xf32>
    %cst_5 = arith.constant 0.000000e+00 : f32
    %7 = vector.broadcast %cst_5 : f32 to vector<256x128xf32>
    %8 = arith.maximumf %6, %7 : vector<256x128xf32>
    %9 = arith.truncf %8 : vector<256x128xf32> to vector<256x128xbf16>
    %c0_6 = arith.constant 0 : index
    %c0_7 = arith.constant 0 : index
    %10 = vector.load %arg4[%c0_6, %c0_7] : memref<128x128xbf16, #tpu.memory_space<vmem>>, vector<128x128xbf16>
    %cst_8 = arith.constant dense<0.000000e+00> : vector<256x128xf32>
    %11 = tpu.matmul %9, %10, %cst_8 {dimension_numbers = #tpu.dot_dimension_numbers<[1], [0], [0], [1], [0, 0, 1, 1], [], []>} : vector<256x128xbf16>, vector<128x128xbf16>, vector<256x128xf32> -> vector<256x128xf32>
    %c0_9 = arith.constant 0 : index
    %c0_10 = arith.constant 0 : index
    %12 = vector.load %arg5[%c0_9, %c0_10] : memref<1x128xf32, #tpu.memory_space<vmem>>, vector<1x128xf32>
    %13 = vector.broadcast %12 : vector<1x128xf32> to vector<256x128xf32>
    %14 = arith.addf %11, %13 : vector<256x128xf32>
    %cst_11 = arith.constant 0.000000e+00 : f32
    %15 = vector.broadcast %cst_11 : f32 to vector<256x128xf32>
    %16 = arith.maximumf %14, %15 : vector<256x128xf32>
    %17 = arith.truncf %16 : vector<256x128xf32> to vector<256x128xbf16>
    %c0_12 = arith.constant 0 : index
    %c0_13 = arith.constant 0 : index
    %18 = vector.load %arg6[%c0_12, %c0_13] : memref<128x4xbf16, #tpu.memory_space<vmem>>, vector<128x4xbf16>
    %cst_14 = arith.constant dense<0.000000e+00> : vector<256x4xf32>
    %19 = tpu.matmul %17, %18, %cst_14 {dimension_numbers = #tpu.dot_dimension_numbers<[1], [0], [0], [1], [0, 0, 1, 1], [], []>} : vector<256x128xbf16>, vector<128x4xbf16>, vector<256x4xf32> -> vector<256x4xf32>
    %c0_15 = arith.constant 0 : index
    %c0_16 = arith.constant 0 : index
    %20 = vector.load %arg7[%c0_15, %c0_16] : memref<1x4xf32, #tpu.memory_space<vmem>>, vector<1x4xf32>
    %21 = vector.broadcast %20 : vector<1x4xf32> to vector<256x4xf32>
    %22 = arith.addf %19, %21 : vector<256x4xf32>
    %c0_17 = arith.constant 0 : index
    %c0_18 = arith.constant 0 : index
    %23 = vector.load %arg8[%c0_17, %c0_18] : memref<256x4xf32, #tpu.memory_space<vmem>>, vector<256x4xf32>
    tpu.vector_store %arg8[%c0_17, %c0_18], %22 {strides = array<i32>} : memref<256x4xf32, #tpu.memory_space<vmem>>, vector<256x4xf32>,
    return
  }
  func.func @transform_0(%arg0: i32) -> (i32, i32) {
    %c0_i32 = arith.constant 0 : i32
    %c0_i32_0 = arith.constant 0 : i32
    return %arg0, %c0_i32 : i32, i32
  }
  func.func @transform_1(%arg0: i32) -> (i32, i32) {
    %c0_i32 = arith.constant 0 : i32
    %c0_i32_0 = arith.constant 0 : i32
    %c0_i32_1 = arith.constant 0 : i32
    return %c0_i32, %c0_i32_0 : i32, i32
  }
  func.func @transform_2(%arg0: i32) -> (i32, i32) {
    %c0_i32 = arith.constant 0 : i32
    %c0_i32_0 = arith.constant 0 : i32
    %c0_i32_1 = arith.constant 0 : i32
    return %c0_i32, %c0_i32_0 : i32, i32
  }
  func.func @transform_3(%arg0: i32) -> (i32, i32) {
    %c0_i32 = arith.constant 0 : i32
    %c0_i32_0 = arith.constant 0 : i32
    %c0_i32_1 = arith.constant 0 : i32
    return %c0_i32, %c0_i32_0 : i32, i32
  }
  func.func @transform_4(%arg0: i32) -> (i32, i32) {
    %c0_i32 = arith.constant 0 : i32
    %c0_i32_0 = arith.constant 0 : i32
    %c0_i32_1 = arith.constant 0 : i32
    return %c0_i32, %c0_i32_0 : i32, i32
  }
  func.func @transform_5(%arg0: i32) -> (i32, i32) {
    %c0_i32 = arith.constant 0 : i32
    %c0_i32_0 = arith.constant 0 : i32
    %c0_i32_1 = arith.constant 0 : i32
    return %c0_i32, %c0_i32_0 : i32, i32
  }
  func.func @transform_6(%arg0: i32) -> (i32, i32) {
    %c0_i32 = arith.constant 0 : i32
    %c0_i32_0 = arith.constant 0 : i32
    %c0_i32_1 = arith.constant 0 : i32
    return %c0_i32, %c0_i32_0 : i32, i32
  }
  func.func @transform_7(%arg0: i32) -> (i32, i32) {
    %c0_i32 = arith.constant 0 : i32
    %c0_i32_0 = arith.constant 0 : i32
    return %arg0, %c0_i32 : i32, i32
  }
}

</mosaic_0001>

<bundles_post_ra>
// kernel: solve_forward.1
= control target key start
LH: loop header
LB: loop body
LE: loop exit
PB: predicated region body
PF: predicated region fallthrough
CT: control target
= control target key end

     0   :  { %vm98_vm0 = vcmask 261120   ;;  %vm868_vm1 = vcmask 31744   ;;  %s1616_s1 = inlined_call_operand.vmem [shape: bf16[32,128], index: 1, kind: input, shape index: {}]   ;;  %s1617_s0 = inlined_call_operand.vmem [shape: f32[256,32], index: 0, kind: input, shape index: {}]   ;;  %s1618_s3 = inlined_call_operand.vmem [shape: bf16[128,128], index: 3, kind: input, shape index: {}]   ;;  %s1619_s5 = inlined_call_operand.vmem [shape: bf16[128,4], index: 5, kind: input, shape index: {}]   ;;  %s1620_s2 = inlined_call_operand.vmem [shape: f32[1,128], index: 2, kind: input, shape index: {}]   ;;  %s1621_s4 = inlined_call_operand.vmem [shape: f32[1,128], index: 4, kind: input, shape index: {}]   ;;  %s1622_s6 = inlined_call_operand.vmem [shape: f32[1,4], index: 6, kind: input, shape index: {}]   ;;  %s1623_s7 = inlined_call_operand.vmem [shape: f32[256,4], index: 7, kind: output, shape index: {}]  }
   0x1   :  { %v1144_v0 = vld [vmem:[%s1616_s1] sm:$0xff]   ;;  %v1145_v1 = vld [vmem:[%s1616_s1 + $0x8] sm:$0xff]   ;;  %v29_v5 = vld [vmem:[%s1617_s0 + $0x10] sm:$0xff] }
   0x2   :  { %1008 = vmatprep.subr.bf16.mxu0 %v1144_v0  ;;  %v27_v2 = vld [vmem:[%s1617_s0] sm:$0xff]  ;;  %v28_v3 = vld [vmem:[%s1617_s0 + $0x8] sm:$0xff]  ;;  %1140 = vmatprep.subr.bf16.mxu1 %v1144_v0  ;;  %v30_v6 = vld [vmem:[%s1617_s0 + $0x18] sm:$0xff] }
   0x3   :  { %1009 = vmatpush3.bf16.msra.mxu0 %v1144_v0  ;;  %v59_v4 = vpack.c.bf16 %v28_v3, %v27_v2  ;;  %1142 = vmatpush3.bf16.msra.mxu1 %v1144_v0  ;;  %v31_v7 = vld [vmem:[%s1617_s0 + $0x20] sm:$0xff]  ;;  %v32_v8 = vld [vmem:[%s1617_s0 + $0x28] sm:$0xff]  ;;  %v60_v9 = vpack.c.bf16 %v30_v6, %v29_v5  ;;  %v45_v14 = vld [vmem:[%s1617_s0 + $0x90] sm:$0xff] }
   0x4   :  { %1010 = vmatprep.subr.bf16.mxu0 %v1145_v1  ;;  %1141 = vmatprep.subr.bf16.mxu1 %v1145_v1  ;;  %v61_v10 = vpack.c.bf16 %v32_v8, %v31_v7  ;;  %v43_v11 = vld [vmem:[%s1617_s0 + $0x80] sm:$0xff]  ;;  %v44_v12 = vld [vmem:[%s1617_s0 + $0x88] sm:$0xff]  ;;  %v46_v15 = vld [vmem:[%s1617_s0 + $0x98] sm:$0xff] }
   0x5   :  { %1012 = vmatprep.mubr.msk.bf16.mxu0 %vm98_vm0, %v59_v4  ;;  %v67_v13 = vpack.c.bf16 %v44_v12, %v43_v11  ;;  %v47_v16 = vld [vmem:[%s1617_s0 + $0xa0] sm:$0xff]  ;;  %v68_v17 = vpack.c.bf16 %v46_v15, %v45_v14  ;;  %v48_v18 = vld [vmem:[%s1617_s0 + $0xa8] sm:$0xff]  ;;  %v33_v19 = vld [vmem:[%s1617_s0 + $0x30] sm:$0xff] }
   0x6   :  { %v34_v20 = vld [vmem:[%s1617_s0 + $0x38] sm:$0xff]  ;;  %v35_v21 = vld [vmem:[%s1617_s0 + $0x40] sm:$0xff]  ;;  %v69_v22 = vpack.c.bf16 %v48_v18, %v47_v16  ;;  %v36_v23 = vld [vmem:[%s1617_s0 + $0x48] sm:$0xff] }
   0x7   :  { %1011 = vmatpush3.bf16.msra.mxu0 %v1145_v1  ;;  %1143 = vmatpush3.bf16.msra.mxu1 %v1145_v1  ;;  %v49_v24 = vld [vmem:[%s1617_s0 + $0xb0] sm:$0xff]  ;;  %v50_v25 = vld [vmem:[%s1617_s0 + $0xb8] sm:$0xff]  ;;  %v51_v26 = vld [vmem:[%s1617_s0 + $0xc0] sm:$0xff]  ;;  %v62_v29 = vpack.c.bf16 %v34_v20, %v33_v19  ;;  %v63_v31 = vpack.c.bf16 %v36_v23, %v35_v21 }
   0x8   :  { %1028 = vmatprep.mubr.msk.bf16.mxu1 %vm98_vm0, %v67_v13  ;;  %v52_v27 = vld [vmem:[%s1617_s0 + $0xc8] sm:$0xff]  ;;  %v1146_v28 = vld [vmem:[%s1618_s3] sm:$0xff]   ;;  %v70_v32 = vpack.c.bf16 %v50_v25, %v49_v24  ;;  %v37_v34 = vld [vmem:[%s1617_s0 + $0x50] sm:$0xff] }
   0x9   :  { %v1147_v30 = vld [vmem:[%s1618_s3 + $0x8] sm:$0xff]   ;;  %1044 = vmatprep.subr.bf16.mxu1 %v1146_v28  ;;  %v71_v33 = vpack.c.bf16 %v52_v27, %v51_v26  ;;  %v38_v35 = vld [vmem:[%s1617_s0 + $0x58] sm:$0xff]  ;;  %v1148_v36 = vld [vmem:[%s1618_s3 + $0x10] sm:$0xff]  }
   0xa   :  { %1013 = vmatmul.mubr.msk.bf16.vlgmr.msra.gmra.mrb[0].mxu0 %vm98_vm0, %v60_v9  ;;  %1029 = vmatmul.mubr.msk.bf16.vlgmr.msra.gmra.mrb[0].mxu1 %vm98_vm0, %v68_v17  ;;  %v39_v37 = vld [vmem:[%s1617_s0 + $0x60] sm:$0xff]  ;;  %v40_v38 = vld [vmem:[%s1617_s0 + $0x68] sm:$0xff]  ;;  %v53_v39 = vld [vmem:[%s1617_s0 + $0xd0] sm:$0xff]  ;;  %v64_v44 = vpack.c.bf16 %v38_v35, %v37_v34 }
   0xb   :  { %1016 = vmatprep.mubr.msk.bf16.mxu0 %vm98_vm0, %v61_v10  ;;  %1032 = vmatprep.mubr.msk.bf16.mxu1 %vm98_vm0, %v69_v22  ;;  %v54_v40 = vld [vmem:[%s1617_s0 + $0xd8] sm:$0xff]  ;;  %v55_v41 = vld [vmem:[%s1617_s0 + $0xe0] sm:$0xff]  ;;  %v56_v42 = vld [vmem:[%s1617_s0 + $0xe8] sm:$0xff]  ;;  %v65_v45 = vpack.c.bf16 %v40_v38, %v39_v37 }
   0xc   :  { %1045 = vmatpush3.bf16.msra.mxu1 %v1146_v28  ;;  %v1149_v43 = vld [vmem:[%s1618_s3 + $0x18] sm:$0xff]   ;;  %v72_v46 = vpack.c.bf16 %v54_v40, %v53_v39  ;;  %v73_v47 = vpack.c.bf16 %v56_v42, %v55_v41  ;;  %v1150_v48 = vld [vmem:[%s1618_s3 + $0x20] sm:$0xff]   ;;  %v41_v49 = vld [vmem:[%s1617_s0 + $0x70] sm:$0xff] }
   0xd   :  { %1046 = vmatprep.subr.bf16.mxu1 %v1147_v30  ;;  %v42_v50 = vld [vmem:[%s1617_s0 + $0x78] sm:$0xff]  ;;  %v57_v51 = vld [vmem:[%s1617_s0 + $0xf0] sm:$0xff]  ;;  %v1151_v53 = vld [vmem:[%s1618_s3 + $0x28] sm:$0xff]  }
   0xe   :  { %v58_v52 = vld [vmem:[%s1617_s0 + $0xf8] sm:$0xff]  ;;  %v66_v54 = vpack.c.bf16 %v42_v50, %v41_v49  ;;  %v1152_v56 = vld [vmem:[%s1618_s3 + $0x30] sm:$0xff]   ;;  %v1154_v58 = vld [vmem:[%s1619_s5] sm:$0xff]  }
   0xf   :  { %v74_v55 = vpack.c.bf16 %v58_v52, %v57_v51  ;;  %v1153_v57 = vld [vmem:[%s1618_s3 + $0x38] sm:$0xff]   ;;  %v1155_v59 = vld [vmem:[%s1619_s5 + $0x8] sm:$0xff]   ;;  %1092 = vmatprep.subr.bf16.mxu0 %v1154_v58  ;;  %v1156_v60 = vld [vmem:[%s1619_s5 + $0x10] sm:$0xff]  }
  0x10   :  { %1047 = vmatpush3.bf16.msra.mxu1 %v1147_v30  ;;  %1093 = vmatpush3.bf16.msra.mxu0 %v1154_v58  ;;  %v1157_v61 = vld [vmem:[%s1619_s5 + $0x18] sm:$0xff]   ;;  %v1158_v62 = vld [vmem:[%s1619_s5 + $0x20] sm:$0xff]   ;;  %v1159_v63 = vld [vmem:[%s1619_s5 + $0x28] sm:$0xff]  }
  0x11   :  { %1048 = vmatprep.subr.bf16.mxu1 %v1148_v36  ;;  %1094 = vmatprep.subr.bf16.mxu0 %v1155_v59  ;;  %v1365_v0 = vld [vmem:[%s1620_s2] ss:$0 sm:$0xff] }
  0x12   :  { %1017 = vmatmul.mubr.msk.bf16.gmra.mrb[4].mxu0 %vm98_vm0, %v62_v29  ;;  %1033 = vmatmul.mubr.msk.bf16.gmra.mrb[4].mxu1 %vm98_vm0, %v70_v32 }
  0x13   :  { %1020 = vmatprep.mubr.msk.bf16.mxu0 %vm98_vm0, %v63_v31  ;;  %1036 = vmatprep.mubr.msk.bf16.mxu1 %vm98_vm0, %v71_v33 }
  0x14   :  { %1049 = vmatpush3.bf16.msra.mxu1 %v1148_v36  ;;  %1095 = vmatpush3.bf16.msra.mxu0 %v1155_v59 }
  0x15   :  { %1050 = vmatprep.subr.bf16.mxu1 %v1149_v43  ;;  %1096 = vmatprep.subr.bf16.mxu0 %v1156_v60 }
  0x18   :  { %1051 = vmatpush3.bf16.msra.mxu1 %v1149_v43  ;;  %1097 = vmatpush3.bf16.msra.mxu0 %v1156_v60 }
  0x19   :  { %1052 = vmatprep.subr.bf16.mxu1 %v1150_v48  ;;  %1098 = vmatprep.subr.bf16.mxu0 %v1157_v61 }
  0x1a   :  { %1021 = vmatmul.mubr.msk.bf16.gmra.mrb[8].mxu0 %vm98_vm0, %v64_v44  ;;  %1037 = vmatmul.mubr.msk.bf16.gmra.mrb[8].mxu1 %vm98_vm0, %v72_v46 }
  0x1b   :  { %1024 = vmatprep.mubr.msk.bf16.mxu0 %vm98_vm0, %v65_v45  ;;  %1040 = vmatprep.mubr.msk.bf16.mxu1 %vm98_vm0, %v73_v47 }
  0x1c   :  { %1053 = vmatpush3.bf16.msra.mxu1 %v1150_v48  ;;  %1099 = vmatpush3.bf16.msra.mxu0 %v1157_v61 }
  0x1d   :  { %1054 = vmatprep.subr.bf16.mxu1 %v1151_v53  ;;  %1100 = vmatprep.subr.bf16.mxu0 %v1158_v62 }
  0x20   :  { %1055 = vmatpush3.bf16.msra.mxu1 %v1151_v53  ;;  %1101 = vmatpush3.bf16.msra.mxu0 %v1158_v62 }
  0x21   :  { %1056 = vmatprep.subr.bf16.mxu1 %v1152_v56  ;;  %1102 = vmatprep.subr.bf16.mxu0 %v1159_v63 }
  0x22   :  { %1025 = vmatmul.mubr.msk.bf16.gmra.mrb[12].mxu0 %vm98_vm0, %v66_v54  ;;  %1041 = vmatmul.mubr.msk.bf16.gmra.mrb[12].mxu1 %vm98_vm0, %v74_v55 }
  0x24   :  { %1057 = vmatpush3.bf16.msra.mxu1 %v1152_v56  ;;  %1103 = vmatpush3.bf16.msra.mxu0 %v1159_v63 }
  0x25   :  { %1058 = vmatprep.subr.bf16.mxu1 %v1153_v57 }
  0x28   :  { %1059 = vmatpush3.bf16.msra.mxu1 %v1153_v57 }
  0xdd   :  { %v1014_v1 = vpop.f32.mrb[0].mxu0  ;;  %v1030_v4 = vpop.f32.mrb[0].mxu1 }
  0xde   :  { %v190_v2 = vadd.f32 %v1014_v1, %v1365_v0  ;;  %v181_v3 = vpop.f32.mrb[1].mxu0  ;;  %v254_v7 = vadd.f32 %v1030_v4, %v1365_v0  ;;  %v245_v8 = vpop.f32.mrb[1].mxu1 }
  0xdf   :  { %v182_v5 = vadd.f32 %v1365_v0, %v181_v3  ;;  %v1015_v6 = vpop.f32.mrb[2].mxu0  ;;  %v246_v11 = vadd.f32 %v1365_v0, %v245_v8  ;;  %v1031_v12 = vpop.f32.mrb[2].mxu1 }
  0xe0   :  { %v193_v9 = vadd.f32 %v1015_v6, %v1365_v0  ;;  %v184_v10 = vpop.f32.mrb[3].mxu0  ;;  %v326_v14 = vmax.f32 %v254_v7, 0.0  ;;  %v257_v15 = vadd.f32 %v1031_v12, %v1365_v0  ;;  %v248_v16 = vpop.f32.mrb[3].mxu1  ;;  %v310_v17 = vmax.f32 %v190_v2, 0.0 }
  0xe1   :  { %v185_v13 = vadd.f32 %v1365_v0, %v184_v10  ;;  %v324_v19 = vmax.f32 %v246_v11, 0.0  ;;  %v249_v20 = vadd.f32 %v1365_v0, %v248_v16  ;;  %v308_v21 = vmax.f32 %v182_v5, 0.0 }
  0xe2   :  { %v311_v18 = vmax.f32 %v193_v9, 0.0  ;;  %v327_v23 = vmax.f32 %v257_v15, 0.0 }
  0xe3   :  { %v309_v22 = vmax.f32 %v185_v13, 0.0  ;;  %v325_v25 = vmax.f32 %v249_v20, 0.0 }
  0xe4   :  { %v341_v24 = vpack.c.bf16 %v311_v18, %v310_v17  ;;  %v1375_v28 = vpack.c.bf16 %v327_v23, %v326_v14 }
  0xe5   :  { %v340_v26 = vpack.c.bf16 %v309_v22, %v308_v21  ;;  %v1018_v27 = vpop.f32.mrb[4].mxu0  ;;  %v1378_v31 = vpack.c.bf16 %v325_v25, %v324_v19  ;;  %v1034_v32 = vpop.f32.mrb[4].mxu1 }
  0xe6   :  { %v206_v29 = vadd.f32 %v1018_v27, %v1365_v0  ;;  %v197_v30 = vpop.f32.mrb[5].mxu0  ;;  %v270_v35 = vadd.f32 %v1034_v32, %v1365_v0  ;;  %v261_v36 = vpop.f32.mrb[5].mxu1 }
  0xe7   :  { %v198_v33 = vadd.f32 %v1365_v0, %v197_v30  ;;  %v1019_v34 = vpop.f32.mrb[6].mxu0  ;;  %1060 = vmatprep.mubr.bf16.mxu1 %v340_v26  ;;  %v262_v39 = vadd.f32 %v1365_v0, %v261_v36  ;;  %v1035_v40 = vpop.f32.mrb[6].mxu1 }
  0xe8   :  { %v209_v37 = vadd.f32 %v1019_v34, %v1365_v0  ;;  %v200_v38 = vpop.f32.mrb[7].mxu0  ;;  %1061 = vmatmul.mubr.bf16.vlgmr.msra.gmra.mrb[16].mxu1 %v341_v24  ;;  %v330_v42 = vmax.f32 %v270_v35, 0.0  ;;  %v273_v43 = vadd.f32 %v1035_v40, %v1365_v0  ;;  %v264_v44 = vpop.f32.mrb[7].mxu1  ;;  %v314_v45 = vmax.f32 %v206_v29, 0.0 }
  0xe9   :  { %v201_v41 = vadd.f32 %v1365_v0, %v200_v38  ;;  %v328_v47 = vmax.f32 %v262_v39, 0.0  ;;  %v265_v48 = vadd.f32 %v1365_v0, %v264_v44  ;;  %v312_v49 = vmax.f32 %v198_v33, 0.0 }
  0xea   :  { %v315_v46 = vmax.f32 %v209_v37, 0.0  ;;  %v331_v51 = vmax.f32 %v273_v43, 0.0 }
  0xeb   :  { %v313_v50 = vmax.f32 %v201_v41, 0.0  ;;  %v329_v53 = vmax.f32 %v265_v48, 0.0 }
  0xec   :  { %v343_v52 = vpack.c.bf16 %v315_v46, %v314_v45  ;;  %v1387_v56 = vpack.c.bf16 %v331_v51, %v330_v42 }
  0xed   :  { %v342_v54 = vpack.c.bf16 %v313_v50, %v312_v49  ;;  %v1022_v55 = vpop.f32.mrb[8].mxu0  ;;  %v350_v59 = vpack.c.bf16 %v329_v53, %v328_v47  ;;  %v1038_v60 = vpop.f32.mrb[8].mxu1 }
  0xee   :  { %v222_v57 = vadd.f32 %v1022_v55, %v1365_v0  ;;  %v213_v58 = vpop.f32.mrb[9].mxu0  ;;  %v286_v63 = vadd.f32 %v1038_v60, %v1365_v0  ;;  %v277_v1 = vpop.f32.mrb[9].mxu1 }
  0xef   :  { %v214_v61 = vadd.f32 %v1365_v0, %v213_v58  ;;  %v1023_v62 = vpop.f32.mrb[10].mxu0  ;;  %1064 = vmatprep.mubr.bf16.mxu1 %v342_v54  ;;  %v278_v4 = vadd.f32 %v1365_v0, %v277_v1  ;;  %v1039_v5 = vpop.f32.mrb[10].mxu1 }
  0xf0   :  { %v225_v2 = vadd.f32 %v1023_v62, %v1365_v0  ;;  %v216_v3 = vpop.f32.mrb[11].mxu0  ;;  %1065 = vmatmul.mubr.bf16.gmra.mrb[20].mxu1 %v343_v52  ;;  %v334_v7 = vmax.f32 %v286_v63, 0.0  ;;  %v289_v8 = vadd.f32 %v1039_v5, %v1365_v0  ;;  %v280_v9 = vpop.f32.mrb[11].mxu1  ;;  %v318_v10 = vmax.f32 %v222_v57, 0.0  ;;  %v1161_v52 = vld [vmem:[%s1619_s5 + $0x38] sm:$0xff]  }
  0xf1   :  { %v217_v6 = vadd.f32 %v1365_v0, %v216_v3  ;;  %v332_v12 = vmax.f32 %v278_v4, 0.0  ;;  %v281_v13 = vadd.f32 %v1365_v0, %v280_v9  ;;  %v316_v14 = vmax.f32 %v214_v61, 0.0 }
  0xf2   :  { %v319_v11 = vmax.f32 %v225_v2, 0.0  ;;  %v335_v16 = vmax.f32 %v289_v8, 0.0 }
  0xf3   :  { %v317_v15 = vmax.f32 %v217_v6, 0.0  ;;  %v333_v18 = vmax.f32 %v281_v13, 0.0 }
  0xf4   :  { %v345_v17 = vpack.c.bf16 %v319_v11, %v318_v10  ;;  %v353_v21 = vpack.c.bf16 %v335_v16, %v334_v7 }
  0xf5   :  { %v344_v19 = vpack.c.bf16 %v317_v15, %v316_v14  ;;  %v1026_v20 = vpop.f32.mrb[12].mxu0  ;;  %v352_v24 = vpack.c.bf16 %v333_v18, %v332_v12  ;;  %v1042_v25 = vpop.f32.mrb[12].mxu1 }
  0xf6   :  { %v238_v22 = vadd.f32 %v1026_v20, %v1365_v0  ;;  %v229_v23 = vpop.f32.mrb[13].mxu0  ;;  %v302_v29 = vadd.f32 %v1042_v25, %v1365_v0  ;;  %v293_v30 = vpop.f32.mrb[13].mxu1 }
  0xf7   :  { %v230_v26 = vadd.f32 %v1365_v0, %v229_v23  ;;  %v1027_v27 = vpop.f32.mrb[14].mxu0  ;;  %1068 = vmatprep.mubr.bf16.mxu1 %v344_v19  ;;  %v294_v34 = vadd.f32 %v1365_v0, %v293_v30  ;;  %v1043_v35 = vpop.f32.mrb[14].mxu1 }
  0xf8   :  { %v241_v32 = vadd.f32 %v1027_v27, %v1365_v0  ;;  %v232_v33 = vpop.f32.mrb[15].mxu0  ;;  %1069 = vmatmul.mubr.bf16.gmra.mrb[24].mxu1 %v345_v17  ;;  %v338_v37 = vmax.f32 %v302_v29, 0.0  ;;  %v305_v38 = vadd.f32 %v1043_v35, %v1365_v0  ;;  %v296_v39 = vpop.f32.mrb[15].mxu1  ;;  %v322_v40 = vmax.f32 %v238_v22, 0.0 }
  0xf9   :  { %v233_v36 = vadd.f32 %v1365_v0, %v232_v33  ;;  %v336_v42 = vmax.f32 %v294_v34, 0.0  ;;  %v297_v43 = vadd.f32 %v1365_v0, %v296_v39  ;;  %v320_v44 = vmax.f32 %v230_v26, 0.0  ;;  %v1160_v0 = vld [vmem:[%s1619_s5 + $0x30] sm:$0xff]  }
  0xfa   :  { %v323_v41 = vmax.f32 %v241_v32, 0.0  ;;  %v339_v46 = vmax.f32 %v305_v38, 0.0  ;;  %1104 = vmatprep.subr.bf16.mxu0 %v1160_v0 }
  0xfb   :  { %v321_v45 = vmax.f32 %v233_v36, 0.0  ;;  %v337_v48 = vmax.f32 %v297_v43, 0.0  ;;  %1105 = vmatpush3.bf16.msra.mxu0 %v1160_v0 }
  0xfc   :  { %v347_v47 = vpack.c.bf16 %v323_v41, %v322_v40  ;;  %v355_v50 = vpack.c.bf16 %v339_v46, %v338_v37  ;;  %1106 = vmatprep.subr.bf16.mxu0 %v1161_v52 }
  0xfd   :  { %v346_v49 = vpack.c.bf16 %v321_v45, %v320_v44  ;;  %v354_v51 = vpack.c.bf16 %v337_v48, %v336_v42 }
  0xff   :  { %1072 = vmatprep.mubr.bf16.mxu1 %v346_v49  ;;  %1107 = vmatpush3.bf16.msra.mxu0 %v1161_v52 }
 0x100   :  { %1073 = vmatmul.mubr.bf16.gmra.mrb[28].mxu1 %v347_v47 }
 0x101   :  { %1076 = vmatprep.mubr.bf16.mxu1 %v1378_v31 }
 0x108   :  { %1077 = vmatmul.mubr.bf16.gmra.mrb[32].mxu1 %v1375_v28  ;;  %v1417_v28 = vld [vmem:[%s1621_s4] ss:$0 sm:$0xff] }
 0x109   :  { %1080 = vmatprep.mubr.bf16.mxu1 %v350_v59 }
 0x110   :  { %1081 = vmatmul.mubr.bf16.gmra.mrb[36].mxu1 %v1387_v56 }
 0x111   :  { %1084 = vmatprep.mubr.bf16.mxu1 %v352_v24 }
 0x118   :  { %1085 = vmatmul.mubr.bf16.gmra.mrb[40].mxu1 %v353_v21 }
 0x119   :  { %1088 = vmatprep.mubr.bf16.mxu1 %v354_v51 }
 0x120   :  { %1089 = vmatmul.mubr.bf16.gmra.mrb[44].mxu1 %v355_v50 }
 0x1bb   :  { %v1062_v31 = vpop.f32.mrb[16].mxu1 }
 0x1bc   :  { %v470_v53 = vadd.f32 %v1062_v31, %v1417_v28  ;;  %v461_v54 = vpop.f32.mrb[17].mxu1 }
 0x1bd   :  { %v462_v55 = vadd.f32 %v1417_v28, %v461_v54  ;;  %v1063_v56 = vpop.f32.mrb[18].mxu1 }
 0x1be   :  { %v473_v57 = vadd.f32 %v1063_v56, %v1417_v28  ;;  %v464_v58 = vpop.f32.mrb[19].mxu1  ;;  %v590_v60 = vmax.f32 %v470_v53, 0.0 }
 0x1bf   :  { %v465_v59 = vadd.f32 %v1417_v28, %v464_v58  ;;  %v588_v62 = vmax.f32 %v462_v55, 0.0 }
 0x1c0   :  { %v591_v61 = vmax.f32 %v473_v57, 0.0 }
 0x1c1   :  { %v589_v63 = vmax.f32 %v465_v59, 0.0 }
 0x1c2   :  { %v621_v1 = vpack.c.bf16 %v591_v61, %v590_v60 }
 0x1c3   :  { %v620_v2 = vpack.c.bf16 %v589_v63, %v588_v62  ;;  %v1066_v3 = vpop.f32.mrb[20].mxu1 }
 0x1c4   :  { %v486_v4 = vadd.f32 %v1066_v3, %v1417_v28  ;;  %v477_v5 = vpop.f32.mrb[21].mxu1 }
 0x1c5   :  { %v478_v6 = vadd.f32 %v1417_v28, %v477_v5  ;;  %v1067_v7 = vpop.f32.mrb[22].mxu1  ;;  %1108 = vmatprep.mubr.bf16.mxu0 %v620_v2 }
 0x1c6   :  { %v489_v8 = vadd.f32 %v1067_v7, %v1417_v28  ;;  %v480_v9 = vpop.f32.mrb[23].mxu1  ;;  %1109 = vmatmul.mubr.bf16.vlgmr.msra.gmra.mrb[16].mxu0 %v621_v1  ;;  %v594_v11 = vmax.f32 %v486_v4, 0.0 }
 0x1c7   :  { %v481_v10 = vadd.f32 %v1417_v28, %v480_v9  ;;  %v592_v13 = vmax.f32 %v478_v6, 0.0 }
 0x1c8   :  { %v595_v12 = vmax.f32 %v489_v8, 0.0 }
 0x1c9   :  { %v593_v14 = vmax.f32 %v481_v10, 0.0 }
 0x1ca   :  { %v623_v15 = vpack.c.bf16 %v595_v12, %v594_v11 }
 0x1cb   :  { %v622_v16 = vpack.c.bf16 %v593_v14, %v592_v13  ;;  %v1070_v17 = vpop.f32.mrb[24].mxu1 }
 0x1cc   :  { %v502_v18 = vadd.f32 %v1070_v17, %v1417_v28  ;;  %v493_v19 = vpop.f32.mrb[25].mxu1 }
 0x1cd   :  { %v494_v20 = vadd.f32 %v1417_v28, %v493_v19  ;;  %v1071_v21 = vpop.f32.mrb[26].mxu1  ;;  %1112 = vmatprep.mubr.bf16.mxu0 %v622_v16 }
 0x1ce   :  { %v505_v22 = vadd.f32 %v1071_v21, %v1417_v28  ;;  %v496_v23 = vpop.f32.mrb[27].mxu1  ;;  %1113 = vmatmul.mubr.bf16.gmra.mrb[20].mxu0 %v623_v15  ;;  %v598_v25 = vmax.f32 %v502_v18, 0.0 }
 0x1cf   :  { %v497_v24 = vadd.f32 %v1417_v28, %v496_v23  ;;  %v596_v27 = vmax.f32 %v494_v20, 0.0 }
 0x1d0   :  { %v599_v26 = vmax.f32 %v505_v22, 0.0 }
 0x1d1   :  { %v597_v29 = vmax.f32 %v497_v24, 0.0 }
 0x1d2   :  { %v625_v30 = vpack.c.bf16 %v599_v26, %v598_v25 }
 0x1d3   :  { %v624_v32 = vpack.c.bf16 %v597_v29, %v596_v27  ;;  %v1074_v33 = vpop.f32.mrb[28].mxu1 }
 0x1d4   :  { %v518_v34 = vadd.f32 %v1074_v33, %v1417_v28  ;;  %v509_v35 = vpop.f32.mrb[29].mxu1 }
 0x1d5   :  { %v510_v36 = vadd.f32 %v1417_v28, %v509_v35  ;;  %v1075_v37 = vpop.f32.mrb[30].mxu1  ;;  %1116 = vmatprep.mubr.bf16.mxu0 %v624_v32 }
 0x1d6   :  { %v521_v38 = vadd.f32 %v1075_v37, %v1417_v28  ;;  %v512_v39 = vpop.f32.mrb[31].mxu1  ;;  %1117 = vmatmul.mubr.bf16.gmra.mrb[24].mxu0 %v625_v30  ;;  %v602_v41 = vmax.f32 %v518_v34, 0.0 }
 0x1d7   :  { %v513_v40 = vadd.f32 %v1417_v28, %v512_v39  ;;  %v600_v43 = vmax.f32 %v510_v36, 0.0 }
 0x1d8   :  { %v603_v42 = vmax.f32 %v521_v38, 0.0 }
 0x1d9   :  { %v601_v44 = vmax.f32 %v513_v40, 0.0  ;;  %v1454_v40 = vld [vmem:[%s1622_s6] ss:$0 sm:$0xff] }
 0x1da   :  { %v627_v45 = vpack.c.bf16 %v603_v42, %v602_v41 }
 0x1db   :  { %v626_v46 = vpack.c.bf16 %v601_v44, %v600_v43  ;;  %v1078_v47 = vpop.f32.mrb[32].mxu1 }
 0x1dc   :  { %v534_v48 = vadd.f32 %v1078_v47, %v1417_v28  ;;  %v525_v49 = vpop.f32.mrb[33].mxu1 }
 0x1dd   :  { %v526_v50 = vadd.f32 %v1417_v28, %v525_v49  ;;  %v1079_v51 = vpop.f32.mrb[34].mxu1  ;;  %1120 = vmatprep.mubr.bf16.mxu0 %v626_v46 }
 0x1de   :  { %v537_v0 = vadd.f32 %v1079_v51, %v1417_v28  ;;  %v528_v52 = vpop.f32.mrb[35].mxu1  ;;  %1121 = vmatmul.mubr.bf16.gmra.mrb[28].mxu0 %v627_v45  ;;  %v606_v53 = vmax.f32 %v534_v48, 0.0 }
 0x1df   :  { %v529_v31 = vadd.f32 %v1417_v28, %v528_v52  ;;  %v604_v55 = vmax.f32 %v526_v50, 0.0 }
 0x1e0   :  { %v607_v54 = vmax.f32 %v537_v0, 0.0 }
 0x1e1   :  { %v605_v56 = vmax.f32 %v529_v31, 0.0 }
 0x1e2   :  { %v629_v57 = vpack.c.bf16 %v607_v54, %v606_v53 }
 0x1e3   :  { %v628_v58 = vpack.c.bf16 %v605_v56, %v604_v55  ;;  %v1082_v59 = vpop.f32.mrb[36].mxu1 }
 0x1e4   :  { %v550_v60 = vadd.f32 %v1082_v59, %v1417_v28  ;;  %v541_v61 = vpop.f32.mrb[37].mxu1 }
 0x1e5   :  { %v542_v62 = vadd.f32 %v1417_v28, %v541_v61  ;;  %v1083_v63 = vpop.f32.mrb[38].mxu1  ;;  %1124 = vmatprep.mubr.bf16.mxu0 %v628_v58 }
 0x1e6   :  { %v553_v1 = vadd.f32 %v1083_v63, %v1417_v28  ;;  %v544_v2 = vpop.f32.mrb[39].mxu1  ;;  %1125 = vmatmul.mubr.bf16.gmra.mrb[32].mxu0 %v629_v57  ;;  %v610_v4 = vmax.f32 %v550_v60, 0.0 }
 0x1e7   :  { %v545_v3 = vadd.f32 %v1417_v28, %v544_v2  ;;  %v608_v6 = vmax.f32 %v542_v62, 0.0 }
 0x1e8   :  { %v611_v5 = vmax.f32 %v553_v1, 0.0 }
 0x1e9   :  { %v609_v7 = vmax.f32 %v545_v3, 0.0 }
 0x1ea   :  { %v631_v8 = vpack.c.bf16 %v611_v5, %v610_v4 }
 0x1eb   :  { %v630_v9 = vpack.c.bf16 %v609_v7, %v608_v6  ;;  %v1086_v10 = vpop.f32.mrb[40].mxu1 }
 0x1ec   :  { %v566_v11 = vadd.f32 %v1086_v10, %v1417_v28  ;;  %v557_v12 = vpop.f32.mrb[41].mxu1 }
 0x1ed   :  { %v558_v13 = vadd.f32 %v1417_v28, %v557_v12  ;;  %v1087_v14 = vpop.f32.mrb[42].mxu1  ;;  %1128 = vmatprep.mubr.bf16.mxu0 %v630_v9 }
 0x1ee   :  { %v569_v15 = vadd.f32 %v1087_v14, %v1417_v28  ;;  %v560_v16 = vpop.f32.mrb[43].mxu1  ;;  %1129 = vmatmul.mubr.bf16.gmra.mrb[36].mxu0 %v631_v8  ;;  %v614_v18 = vmax.f32 %v566_v11, 0.0 }
 0x1ef   :  { %v561_v17 = vadd.f32 %v1417_v28, %v560_v16  ;;  %v612_v20 = vmax.f32 %v558_v13, 0.0 }
 0x1f0   :  { %v615_v19 = vmax.f32 %v569_v15, 0.0 }
 0x1f1   :  { %v613_v21 = vmax.f32 %v561_v17, 0.0 }
 0x1f2   :  { %v633_v22 = vpack.c.bf16 %v615_v19, %v614_v18 }
 0x1f3   :  { %v632_v23 = vpack.c.bf16 %v613_v21, %v612_v20  ;;  %v1090_v24 = vpop.f32.mrb[44].mxu1 }
 0x1f4   :  { %v582_v25 = vadd.f32 %v1090_v24, %v1417_v28  ;;  %v573_v26 = vpop.f32.mrb[45].mxu1 }
 0x1f5   :  { %v574_v27 = vadd.f32 %v1417_v28, %v573_v26  ;;  %v1091_v29 = vpop.f32.mrb[46].mxu1  ;;  %1132 = vmatprep.mubr.bf16.mxu0 %v632_v23 }
 0x1f6   :  { %v585_v30 = vadd.f32 %v1091_v29, %v1417_v28  ;;  %v576_v32 = vpop.f32.mrb[47].mxu1  ;;  %1133 = vmatmul.mubr.bf16.gmra.mrb[40].mxu0 %v633_v22  ;;  %v618_v34 = vmax.f32 %v582_v25, 0.0 }
 0x1f7   :  { %v577_v33 = vadd.f32 %v1417_v28, %v576_v32  ;;  %v616_v36 = vmax.f32 %v574_v27, 0.0 }
 0x1f8   :  { %v619_v35 = vmax.f32 %v585_v30, 0.0 }
 0x1f9   :  { %v617_v37 = vmax.f32 %v577_v33, 0.0 }
 0x1fa   :  { %v635_v38 = vpack.c.bf16 %v619_v35, %v618_v34 }
 0x1fb   :  { %v634_v39 = vpack.c.bf16 %v617_v37, %v616_v36 }
 0x1fd   :  { %1136 = vmatprep.mubr.bf16.mxu0 %v634_v39 }
 0x1fe   :  { %1137 = vmatmul.mubr.bf16.gmra.mrb[44].mxu0 %v635_v38 }
 0x299   :  { %v1110_v41 = vpop.f32.mrb[16].mxu0 }
 0x29a   :  { %v750_v42 = vadd.f32 %v1110_v41, %v1454_v40  ;;  %v741_v43 = vpop.f32.mrb[17].mxu0 }
 0x29b   :  { %v742_v28 = vadd.f32 %v1454_v40, %v741_v43  ;;  %v1111_v44 = vpop.f32.mrb[18].mxu0 }
 0x29c   :  { %871 = vst.msk [vmem:[%s1623_s7 + $0x10] sm:$0xff] %vm868_vm1, %v750_v42  ;;  %v753_v45 = vadd.f32 %v1111_v44, %v1454_v40  ;;  %v744_v46 = vpop.f32.mrb[19].mxu0 }
 0x29d   :  { %869 = vst.msk [vmem:[%s1623_s7] sm:$0xff] %vm868_vm1, %v742_v28  ;;  %v745_v47 = vadd.f32 %v1454_v40, %v744_v46 }
 0x29e   :  { %872 = vst.msk [vmem:[%s1623_s7 + $0x18] sm:$0xff] %vm868_vm1, %v753_v45 }
 0x29f   :  { %870 = vst.msk [vmem:[%s1623_s7 + $0x8] sm:$0xff] %vm868_vm1, %v745_v47 }
 0x2a1   :  { %v1114_v48 = vpop.f32.mrb[20].mxu0 }
 0x2a2   :  { %v766_v49 = vadd.f32 %v1114_v48, %v1454_v40  ;;  %v757_v50 = vpop.f32.mrb[21].mxu0 }
 0x2a3   :  { %v758_v51 = vadd.f32 %v1454_v40, %v757_v50  ;;  %v1115_v0 = vpop.f32.mrb[22].mxu0 }
 0x2a4   :  { %875 = vst.msk [vmem:[%s1623_s7 + $0x30] sm:$0xff] %vm868_vm1, %v766_v49  ;;  %v769_v52 = vadd.f32 %v1115_v0, %v1454_v40  ;;  %v760_v31 = vpop.f32.mrb[23].mxu0 }
 0x2a5   :  { %873 = vst.msk [vmem:[%s1623_s7 + $0x20] sm:$0xff] %vm868_vm1, %v758_v51  ;;  %v761_v53 = vadd.f32 %v1454_v40, %v760_v31 }
 0x2a6   :  { %876 = vst.msk [vmem:[%s1623_s7 + $0x38] sm:$0xff] %vm868_vm1, %v769_v52 }
 0x2a7   :  { %874 = vst.msk [vmem:[%s1623_s7 + $0x28] sm:$0xff] %vm868_vm1, %v761_v53 }
 0x2a9   :  { %v1118_v54 = vpop.f32.mrb[24].mxu0 }
 0x2aa   :  { %v782_v55 = vadd.f32 %v1118_v54, %v1454_v40  ;;  %v773_v56 = vpop.f32.mrb[25].mxu0 }
 0x2ab   :  { %v774_v57 = vadd.f32 %v1454_v40, %v773_v56  ;;  %v1119_v58 = vpop.f32.mrb[26].mxu0 }
 0x2ac   :  { %879 = vst.msk [vmem:[%s1623_s7 + $0x50] sm:$0xff] %vm868_vm1, %v782_v55  ;;  %v785_v59 = vadd.f32 %v1119_v58, %v1454_v40  ;;  %v776_v60 = vpop.f32.mrb[27].mxu0 }
 0x2ad   :  { %877 = vst.msk [vmem:[%s1623_s7 + $0x40] sm:$0xff] %vm868_vm1, %v774_v57  ;;  %v777_v61 = vadd.f32 %v1454_v40, %v776_v60 }
 0x2ae   :  { %880 = vst.msk [vmem:[%s1623_s7 + $0x58] sm:$0xff] %vm868_vm1, %v785_v59 }
 0x2af   :  { %878 = vst.msk [vmem:[%s1623_s7 + $0x48] sm:$0xff] %vm868_vm1, %v777_v61 }
 0x2b1   :  { %v1122_v62 = vpop.f32.mrb[28].mxu0 }
 0x2b2   :  { %v798_v63 = vadd.f32 %v1122_v62, %v1454_v40  ;;  %v789_v1 = vpop.f32.mrb[29].mxu0 }
 0x2b3   :  { %v790_v2 = vadd.f32 %v1454_v40, %v789_v1  ;;  %v1123_v3 = vpop.f32.mrb[30].mxu0 }
 0x2b4   :  { %883 = vst.msk [vmem:[%s1623_s7 + $0x70] sm:$0xff] %vm868_vm1, %v798_v63  ;;  %v801_v4 = vadd.f32 %v1123_v3, %v1454_v40  ;;  %v792_v5 = vpop.f32.mrb[31].mxu0 }
 0x2b5   :  { %881 = vst.msk [vmem:[%s1623_s7 + $0x60] sm:$0xff] %vm868_vm1, %v790_v2  ;;  %v793_v6 = vadd.f32 %v1454_v40, %v792_v5 }
 0x2b6   :  { %884 = vst.msk [vmem:[%s1623_s7 + $0x78] sm:$0xff] %vm868_vm1, %v801_v4 }
 0x2b7   :  { %882 = vst.msk [vmem:[%s1623_s7 + $0x68] sm:$0xff] %vm868_vm1, %v793_v6 }
 0x2b9   :  { %v1126_v7 = vpop.f32.mrb[32].mxu0 }
 0x2ba   :  { %v814_v8 = vadd.f32 %v1126_v7, %v1454_v40  ;;  %v805_v9 = vpop.f32.mrb[33].mxu0 }
 0x2bb   :  { %v806_v10 = vadd.f32 %v1454_v40, %v805_v9  ;;  %v1127_v11 = vpop.f32.mrb[34].mxu0 }
 0x2bc   :  { %887 = vst.msk [vmem:[%s1623_s7 + $0x90] sm:$0xff] %vm868_vm1, %v814_v8  ;;  %v817_v12 = vadd.f32 %v1127_v11, %v1454_v40  ;;  %v808_v13 = vpop.f32.mrb[35].mxu0 }
 0x2bd   :  { %885 = vst.msk [vmem:[%s1623_s7 + $0x80] sm:$0xff] %vm868_vm1, %v806_v10  ;;  %v809_v14 = vadd.f32 %v1454_v40, %v808_v13 }
 0x2be   :  { %888 = vst.msk [vmem:[%s1623_s7 + $0x98] sm:$0xff] %vm868_vm1, %v817_v12 }
 0x2bf   :  { %886 = vst.msk [vmem:[%s1623_s7 + $0x88] sm:$0xff] %vm868_vm1, %v809_v14 }
 0x2c1   :  { %v1130_v15 = vpop.f32.mrb[36].mxu0 }
 0x2c2   :  { %v830_v16 = vadd.f32 %v1130_v15, %v1454_v40  ;;  %v821_v17 = vpop.f32.mrb[37].mxu0 }
 0x2c3   :  { %v822_v18 = vadd.f32 %v1454_v40, %v821_v17  ;;  %v1131_v19 = vpop.f32.mrb[38].mxu0 }
 0x2c4   :  { %891 = vst.msk [vmem:[%s1623_s7 + $0xb0] sm:$0xff] %vm868_vm1, %v830_v16  ;;  %v833_v20 = vadd.f32 %v1131_v19, %v1454_v40  ;;  %v824_v21 = vpop.f32.mrb[39].mxu0 }
 0x2c5   :  { %889 = vst.msk [vmem:[%s1623_s7 + $0xa0] sm:$0xff] %vm868_vm1, %v822_v18  ;;  %v825_v22 = vadd.f32 %v1454_v40, %v824_v21 }
 0x2c6   :  { %892 = vst.msk [vmem:[%s1623_s7 + $0xb8] sm:$0xff] %vm868_vm1, %v833_v20 }
 0x2c7   :  { %890 = vst.msk [vmem:[%s1623_s7 + $0xa8] sm:$0xff] %vm868_vm1, %v825_v22 }
 0x2c9   :  { %v1134_v23 = vpop.f32.mrb[40].mxu0 }
 0x2ca   :  { %v846_v24 = vadd.f32 %v1134_v23, %v1454_v40  ;;  %v837_v25 = vpop.f32.mrb[41].mxu0 }
 0x2cb   :  { %v838_v26 = vadd.f32 %v1454_v40, %v837_v25  ;;  %v1135_v27 = vpop.f32.mrb[42].mxu0 }
 0x2cc   :  { %895 = vst.msk [vmem:[%s1623_s7 + $0xd0] sm:$0xff] %vm868_vm1, %v846_v24  ;;  %v849_v29 = vadd.f32 %v1135_v27, %v1454_v40  ;;  %v840_v30 = vpop.f32.mrb[43].mxu0 }
 0x2cd   :  { %893 = vst.msk [vmem:[%s1623_s7 + $0xc0] sm:$0xff] %vm868_vm1, %v838_v26  ;;  %v841_v32 = vadd.f32 %v1454_v40, %v840_v30 }
 0x2ce   :  { %896 = vst.msk [vmem:[%s1623_s7 + $0xd8] sm:$0xff] %vm868_vm1, %v849_v29 }
 0x2cf   :  { %894 = vst.msk [vmem:[%s1623_s7 + $0xc8] sm:$0xff] %vm868_vm1, %v841_v32 }
 0x2d1   :  { %v1138_v33 = vpop.f32.mrb[44].mxu0 }
 0x2d2   :  { %v862_v34 = vadd.f32 %v1138_v33, %v1454_v40  ;;  %v853_v35 = vpop.f32.mrb[45].mxu0 }
 0x2d3   :  { %v854_v36 = vadd.f32 %v1454_v40, %v853_v35  ;;  %v1139_v37 = vpop.f32.mrb[46].mxu0 }
 0x2d4   :  { %899 = vst.msk [vmem:[%s1623_s7 + $0xf0] sm:$0xff] %vm868_vm1, %v862_v34  ;;  %v865_v38 = vadd.f32 %v1139_v37, %v1454_v40  ;;  %v856_v39 = vpop.f32.mrb[47].mxu0 }
 0x2d5   :  { %897 = vst.msk [vmem:[%s1623_s7 + $0xe0] sm:$0xff] %vm868_vm1, %v854_v36  ;;  %v857_v41 = vadd.f32 %v1454_v40, %v856_v39 }
 0x2d6   :  { %900 = vst.msk [vmem:[%s1623_s7 + $0xf8] sm:$0xff] %vm868_vm1, %v865_v38 }
 0x2d7   :  { %898 = vst.msk [vmem:[%s1623_s7 + $0xe8] sm:$0xff] %vm868_vm1, %v857_v41 }

</bundles_post_ra>
